<compile_context>
chip_gen: v7x
topology: tpu7x:2x2x1
jax: 0.10.0
libtpu: 0.0.40
codegen_flags: <defaults>
</compile_context>

<pallas_src>
import jax
import jax.numpy as jnp
from jax.experimental import pallas as pl
from jax.experimental.pallas import tpu as pltpu

EMB_IN = 384          # fixed by the module (Lunit DINO ViT-S output dim)
EMBEDDING_DIM = 32    # WSINetwork(embedding_dim=32) for the synthetic run

ROW_GRANULE = 16      # bf16 packs 16 rows per vreg (sublane-pair granule)


def _round_up(x, m):
    return (x + m - 1) // m * m


def linear_relu_kernel(x_ref, w_ref, b_ref, o_ref):
    # x_ref: [TM, 384] f32    w_ref: [384, E] bf16
    # b_ref: [1, E]    f32    o_ref: [TM, E] bf16
    x = x_ref[...].astype(jnp.bfloat16)   # in-kernel cast: no separate HBM convert pass
    y = jnp.dot(x, w_ref[...], preferred_element_type=jnp.float32)
    y = y + b_ref[...]                    # f32 epilogue (native everywhere)
    o_ref[...] = jnp.maximum(y, 0.0).astype(o_ref.dtype)


def _pick_tm(n, tm_max):
    """Tile size over the patch axis.

    - >= 2 grid steps whenever the bag is big enough, so the 'parallel' grid
      axis can shard across both TensorCores on v7x.
    - multiple of 16 rows (bf16 packing granule), capped at tm_max.
    """
    if n <= 2 * tm_max:
        tm = _round_up(max(pl.cdiv(n, 2), 1), ROW_GRANULE)
        return max(min(tm, tm_max), ROW_GRANULE)
    return tm_max


def wsi_network_forward(embeddings, w_bf16, b_f32, *, tm=2048):
    """ReLU(embeddings @ w + b), tiled over the patch (N) dimension.

    embeddings: [N, 384] float32 (cast to bf16 inside the kernel)
    w_bf16:     [384, E] bfloat16 (transposed PyTorch Linear weight)
    b_f32:      [1, E]   float32
    returns:    [N, E]   bfloat16
    """
    n, k = embeddings.shape
    e = w_bf16.shape[1]

    tm = _pick_tm(n, tm)
    grid = (pl.cdiv(n, tm),)   # ragged last block is masked by Pallas

    cost = pl.CostEstimate(
        flops=2 * n * k * e,
        transcendentals=0,
        bytes_accessed=(n * k * 4        # f32 activations read
                        + k * e * 2      # bf16 weights read
                        + e * 4          # f32 bias read
                        + n * e * 2),    # bf16 output write
    )

    return pl.pallas_call(
        linear_relu_kernel,
        out_shape=jax.ShapeDtypeStruct((n, e), jnp.bfloat16),
        grid_spec=pltpu.PrefetchScalarGridSpec(
            num_scalar_prefetch=0,
            grid=grid,
            in_specs=[
                pl.BlockSpec((tm, k), lambda i: (i, 0)),   # x: tiled over N
                pl.BlockSpec((k, e), lambda i: (0, 0)),    # w: VMEM-resident
                pl.BlockSpec((1, e), lambda i: (0, 0)),    # b: VMEM-resident
            ],
            out_specs=pl.BlockSpec((tm, e), lambda i: (i, 0)),
        ),
        compiler_params=pltpu.CompilerParams(
            # Independent N tiles -> shard across both TensorCores on v7x.
            dimension_semantics=("parallel",),
        ),
        cost_estimate=cost,
    )(embeddings, w_bf16, b_f32)


def init_params(key, in_dim, out_dim):
    """Deterministic init matching nn.Linear's default (uniform ±1/sqrt(in)).

    Returns the kernel-ready (hoisted, one-time) parameter layout:
      w_bf16: [in_dim, out_dim] bfloat16, b_f32: [1, out_dim] float32.
    """
    kw, kb = jax.random.split(key)
    bound = 1.0 / jnp.sqrt(jnp.float32(in_dim))
    # PyTorch weight is [out, in]; store transposed [in, out] for the kernel.
    w_t = jax.random.uniform(kw, (in_dim, out_dim), jnp.float32, -bound, bound)
    b = jax.random.uniform(kb, (out_dim,), jnp.float32, -bound, bound)
    return w_t.astype(jnp.bfloat16), b.reshape(1, -1).astype(jnp.float32)


if __name__ == "__main__":
    key = jax.random.PRNGKey(0)
    k_x, k_p = jax.random.split(key)

    n_patches = 8  # number of WSI patch embeddings in the "bag"
    # Synthetic stand-in for WSIEncoder.get_wsi_embeddings(x_wsi): [N, 384]
    embeddings = jax.random.normal(k_x, (n_patches, EMB_IN), dtype=jnp.float32)

    w_bf16, b_f32 = init_params(k_p, EMB_IN, EMBEDDING_DIM)

    out = wsi_network_forward(embeddings, w_bf16, b_f32)
    out = jax.block_until_ready(out)

    # Reference: same in-kernel bf16 cast of activations/weights, f32 accumulate,
    # f32 bias + ReLU; output compared at bf16 precision (~0.4% relative).
    x_ref = embeddings.astype(jnp.bfloat16).astype(jnp.float32)
    w_ref = w_bf16.astype(jnp.float32)
    ref = jnp.maximum(x_ref @ w_ref + b_f32, 0.0)

    assert out.shape == (n_patches, EMBEDDING_DIM)
    assert out.dtype == jnp.bfloat16
    assert jnp.allclose(out.astype(jnp.float32), ref, atol=2e-2, rtol=2e-2)

    print("KERNEL_OK")
</pallas_src>

<mosaic_0001>
module attributes {stable_mosaic.version = 11 : i64} {
  func.func @linear_relu_kernel(%arg0: i32, %arg1: memref<16x384xf32, #tpu.memory_space<vmem>>, %arg2: memref<384x32xbf16, #tpu.memory_space<vmem>>, %arg3: memref<1x32xf32, #tpu.memory_space<vmem>>, %arg4: memref<16x32xbf16, #tpu.memory_space<vmem>>) attributes {dimension_semantics = [#tpu.dimension_semantics<parallel>], iteration_bounds = array<i64: 1>, scalar_prefetch = 0 : i64, scratch_operands = 0 : i64, tpu.core_type = #tpu.core_type<tc>, window_params = [{transform_indices = @transform_0, window_bounds = array<i64: 16, 384>}, {pipeline_mode = #tpu.pipeline_mode<synchronous>, transform_indices = @transform_1, window_bounds = array<i64: 384, 32>}, {pipeline_mode = #tpu.pipeline_mode<synchronous>, transform_indices = @transform_2, window_bounds = array<i64: 1, 32>}, {transform_indices = @transform_3, window_bounds = array<i64: 16, 32>}]} {
    %c0 = arith.constant 0 : index
    %c0_0 = arith.constant 0 : index
    %0 = vector.load %arg1[%c0, %c0_0] : memref<16x384xf32, #tpu.memory_space<vmem>>, vector<16x384xf32>
    %1 = arith.truncf %0 : vector<16x384xf32> to vector<16x384xbf16>
    %c0_1 = arith.constant 0 : index
    %c0_2 = arith.constant 0 : index
    %2 = vector.load %arg2[%c0_1, %c0_2] : memref<384x32xbf16, #tpu.memory_space<vmem>>, vector<384x32xbf16>
    %cst = arith.constant dense<0.000000e+00> : vector<16x32xf32>
    %3 = tpu.matmul %1, %2, %cst {dimension_numbers = #tpu.dot_dimension_numbers<[1], [0], [0], [1], [0, 0, 1, 1], [], []>} : vector<16x384xbf16>, vector<384x32xbf16>, vector<16x32xf32> -> vector<16x32xf32>
    %c0_3 = arith.constant 0 : index
    %c0_4 = arith.constant 0 : index
    %4 = vector.load %arg3[%c0_3, %c0_4] : memref<1x32xf32, #tpu.memory_space<vmem>>, vector<1x32xf32>
    %5 = vector.broadcast %4 : vector<1x32xf32> to vector<16x32xf32>
    %6 = arith.addf %3, %5 : vector<16x32xf32>
    %cst_5 = arith.constant 0.000000e+00 : f32
    %7 = vector.broadcast %cst_5 : f32 to vector<16x32xf32>
    %8 = arith.maximumf %6, %7 : vector<16x32xf32>
    %9 = arith.truncf %8 : vector<16x32xf32> to vector<16x32xbf16>
    %c0_6 = arith.constant 0 : index
    %c0_7 = arith.constant 0 : index
    %10 = vector.load %arg4[%c0_6, %c0_7] : memref<16x32xbf16, #tpu.memory_space<vmem>>, vector<16x32xbf16>
    tpu.vector_store %arg4[%c0_6, %c0_7], %9 {strides = array<i32>} : memref<16x32xbf16, #tpu.memory_space<vmem>>, vector<16x32xbf16>,
    return
  }
  func.func @transform_0(%arg0: i32) -> (i32, i32) {
    %c0_i32 = arith.constant 0 : i32
    %c0_i32_0 = arith.constant 0 : i32
    return %arg0, %c0_i32 : i32, i32
  }
  func.func @transform_1(%arg0: i32) -> (i32, i32) {
    %c0_i32 = arith.constant 0 : i32
    %c0_i32_0 = arith.constant 0 : i32
    %c0_i32_1 = arith.constant 0 : i32
    return %c0_i32, %c0_i32_0 : i32, i32
  }
  func.func @transform_2(%arg0: i32) -> (i32, i32) {
    %c0_i32 = arith.constant 0 : i32
    %c0_i32_0 = arith.constant 0 : i32
    %c0_i32_1 = arith.constant 0 : i32
    return %c0_i32, %c0_i32_0 : i32, i32
  }
  func.func @transform_3(%arg0: i32) -> (i32, i32) {
    %c0_i32 = arith.constant 0 : i32
    %c0_i32_0 = arith.constant 0 : i32
    return %arg0, %c0_i32 : i32, i32
  }
}

</mosaic_0001>

<bundles_post_ra>
// kernel: tpu_custom_call.1
= control target key start
LH: loop header
LB: loop body
LE: loop exit
PB: predicated region body
PF: predicated region fallthrough
CT: control target
= control target key end

     0   :  { %8 = vsyncpa [#allocation3], 0  ;;  %v468_v2 = vmov 0.0   ;;  %vm469_vm0 = vmmov 0   ;;  %vm316_vm1 = vcmask 257024   ;;  %s598_s0 = inlined_call_operand.vmem [shape: f32[8,384], index: 0, kind: input, shape index: {}]   ;;  %s599_s1 = inlined_call_operand.vmem [shape: bf16[384,32], index: 1, kind: input, shape index: {}]   ;;  %s600_s2 = inlined_call_operand.vmem [shape: f32[1,32], index: 2, kind: input, shape index: {}]   ;;  %s601_s3 = inlined_call_operand.hbm [shape: bf16[8,32], index: 3, kind: output, shape index: {}]  }
   0x1   :  { %v420_v0 = vld [vmem:[%s599_s1 + $0x40] sm:$0xff]   ;;  %395 = vmatprep.subr.bf16.mxu1 %v468_v2  ;;  %411 = vmatprep.mubr.msk.bf16.mxu1 %vm469_vm0, %v468_v2  ;;  %v423_v4 = vld [vmem:[%s599_s1 + $0x48] sm:$0xff]   ;;  %v426_v7 = vld [vmem:[%s599_s1 + $0x50] sm:$0xff]  }
   0x2   :  { %v421_v1 = vld [vmem:[%s599_s1] sm:$0xff]   ;;  %364 = vmatprep.subr.bf16.mxu0 %v420_v0  ;;  %v424_v5 = vld [vmem:[%s599_s1 + $0x8] sm:$0xff]   ;;  %v427_v8 = vld [vmem:[%s599_s1 + $0x10] sm:$0xff]  }
   0x3   :  { %v422_v3 = vld [vmem:[%s599_s1 + $0x80] sm:$0xff]   ;;  %365 = vmatpush3.bf16.msra.mxu0 %v421_v1  ;;  %v425_v6 = vld [vmem:[%s599_s1 + $0x88] sm:$0xff]   ;;  %v428_v9 = vld [vmem:[%s599_s1 + $0x90] sm:$0xff]  }
   0x4   :  { %396 = vmatpush3.bf16.msra.mxu1 %v422_v3  ;;  %366 = vmatprep.subr.bf16.mxu0 %v423_v4  ;;  %v429_v10 = vld [vmem:[%s599_s1 + $0x58] sm:$0xff]   ;;  %v432_v13 = vld [vmem:[%s599_s1 + $0x60] sm:$0xff]   ;;  %v435_v16 = vld [vmem:[%s599_s1 + $0x68] sm:$0xff]  }
   0x5   :  { %397 = vmatprep.subr.bf16.mxu1 %v468_v2  ;;  %v430_v11 = vld [vmem:[%s599_s1 + $0x18] sm:$0xff]   ;;  %v433_v14 = vld [vmem:[%s599_s1 + $0x20] sm:$0xff]   ;;  %v436_v17 = vld [vmem:[%s599_s1 + $0x28] sm:$0xff]  }
   0x6   :  { %v431_v12 = vld [vmem:[%s599_s1 + $0x98] sm:$0xff]   ;;  %v434_v15 = vld [vmem:[%s599_s1 + $0xa0] sm:$0xff]   ;;  %v437_v18 = vld [vmem:[%s599_s1 + $0xa8] sm:$0xff]  }
   0x7   :  { %367 = vmatpush3.bf16.msra.mxu0 %v424_v5  ;;  %v438_v19 = vld [vmem:[%s599_s1 + $0x70] sm:$0xff]   ;;  %v17_v20 = vld [vmem:[%s598_s0 + $0x8] sm:$0xff]  ;;  %v20_v21 = vld [vmem:[%s598_s0 + $0x20] sm:$0xff] }
   0x8   :  { %398 = vmatpush3.bf16.msra.mxu1 %v425_v6  ;;  %368 = vmatprep.subr.bf16.mxu0 %v426_v7  ;;  %v439_v22 = vld [vmem:[%s599_s1 + $0x30] sm:$0xff]   ;;  %v23_v23 = vpack.c.bf16 %v20_v21, %v17_v20  ;;  %v441_v25 = vld [vmem:[%s599_s1 + $0x78] sm:$0xff]   ;;  %v16_v27 = vld [vmem:[%s598_s0] sm:$0xff] }
   0x9   :  { %399 = vmatprep.subr.bf16.mxu1 %v468_v2  ;;  %v440_v24 = vld [vmem:[%s599_s1 + $0xb0] sm:$0xff]   ;;  %v442_v26 = vld [vmem:[%s599_s1 + $0x38] sm:$0xff]   ;;  %v21_v31 = vld [vmem:[%s598_s0 + $0x28] sm:$0xff] }
   0xa   :  { %256 = vmatprep.mubr.bf16.mxu0 %v23_v23  ;;  %v19_v28 = vld [vmem:[%s598_s0 + $0x18] sm:$0xff]  ;;  %v18_v30 = vld [vmem:[%s598_s0 + $0x10] sm:$0xff]  ;;  %v335_v36 = vld [vmem:[%s600_s2] ss:$0 sm:$0xff] }
   0xb   :  { %369 = vmatpush3.bf16.msra.mxu0 %v427_v8  ;;  %v443_v29 = vld [vmem:[%s599_s1 + $0xb8] sm:$0xff]   ;;  %v22_v32 = vpack.c.bf16 %v19_v28, %v16_v27  ;;  %v24_v33 = vpack.c.bf16 %v21_v31, %v18_v30 }
   0xc   :  { %400 = vmatpush3.bf16.msra.mxu1 %v428_v9  ;;  %370 = vmatprep.subr.bf16.mxu0 %v429_v10 }
   0xd   :  { %401 = vmatprep.subr.bf16.mxu1 %v468_v2 }
   0xf   :  { %371 = vmatpush3.bf16.msra.mxu0 %v430_v11 }
  0x10   :  { %402 = vmatpush3.bf16.msra.mxu1 %v431_v12  ;;  %372 = vmatprep.subr.bf16.mxu0 %v432_v13 }
  0x11   :  { %403 = vmatprep.subr.bf16.mxu1 %v468_v2 }
  0x13   :  { %373 = vmatpush3.bf16.msra.mxu0 %v433_v14 }
  0x14   :  { %404 = vmatpush3.bf16.msra.mxu1 %v434_v15  ;;  %374 = vmatprep.subr.bf16.mxu0 %v435_v16 }
  0x15   :  { %405 = vmatprep.subr.bf16.mxu1 %v468_v2 }
  0x17   :  { %375 = vmatpush3.bf16.msra.mxu0 %v436_v17 }
  0x18   :  { %406 = vmatpush3.bf16.msra.mxu1 %v437_v18  ;;  %376 = vmatprep.subr.bf16.mxu0 %v438_v19 }
  0x19   :  { %407 = vmatprep.subr.bf16.mxu1 %v468_v2 }
  0x1b   :  { %377 = vmatpush3.bf16.msra.mxu0 %v439_v22 }
  0x1c   :  { %408 = vmatpush3.bf16.msra.mxu1 %v440_v24  ;;  %378 = vmatprep.subr.bf16.mxu0 %v441_v25 }
  0x1d   :  { %409 = vmatprep.subr.bf16.mxu1 %v468_v2 }
  0x1f   :  { %379 = vmatpush3.bf16.msra.mxu0 %v442_v26 }
  0x20   :  { %410 = vmatpush3.bf16.msra.mxu1 %v443_v29 }
  0x22   :  { %257 = vmatmul.mubr.bf16.vlgmr.msra.gmra.mrb[0].mxu0 %v22_v32 }
  0x23   :  { %412 = vmatmul.mubr.bf16.vlgmr.msra.gmra.mrb[0].mxu1 %v24_v33 }
  0xf5   :  { %v380_v34 = vpop.f32.mrb[0].mxu0 }
  0xf6   :  { %v381_v35 = vpop.f32.mrb[1].mxu0  ;;  %v299_v37 = vpop.f32.mrb[0].mxu1 }
  0xf7   :  { %v382_v38 = vadd.f32 %v381_v35, %v380_v34  ;;  %v383_v39 = vpop.f32.mrb[2].mxu0  ;;  %v413_v40 = vpop.f32.mrb[1].mxu1 }
  0xf8   :  { %v384_v41 = vpop.f32.mrb[3].mxu0  ;;  %v302_v42 = vpop.f32.mrb[2].mxu1 }
  0xf9   :  { %v259_v43 = vadd.f32 %v382_v38, %v335_v36  ;;  %v385_v44 = vadd.f32 %v384_v41, %v383_v39  ;;  %v414_v45 = vpop.f32.mrb[3].mxu1 }
  0xfb   :  { %v300_v46 = vadd.f32 %v299_v37, %v259_v43  ;;  %v262_v47 = vadd.f32 %v385_v44, %v335_v36 }
  0xfd   :  { %v306_v48 = vmax.f32 %v300_v46, 0.0  ;;  %v303_v49 = vadd.f32 %v302_v42, %v262_v47 }
  0xff   :  { %v362_v50 = vpack.c.bf16 %v306_v48, %v306_v48  ;;  %v307_v51 = vmax.f32 %v303_v49, 0.0 }
 0x101   :  { %317 = vst.msk [vmem:[#allocation2] sm:$0xf] %vm316_vm1, %v362_v50  ;;  %v363_v52 = vpack.c.bf16 %v307_v51, %v307_v51 }
 0x103   :  { %318 = vst.msk [vmem:[#allocation2 + $0x4] sm:$0xf] %vm316_vm1, %v363_v52 }
 0x104   :  { %323 = vsyncadd [#allocation3], 64  ;;  %s470_s0 = smov [#allocation2]  }
 0x105   :  { %s324_s1 = sshll.u32 %s470_s0, 4  ;;  %s325_s1 = int_to_ptr.vmem [resolvable:$true] %s324_s1 }
 0x106   :  { %s444_s2 = scalar_lea.vmem %s325_s1, 64  ;;  %s448_s20 = scalar_lea.vmem %s325_s1, 128 }
 0x107   :  { %p445_p0 = scmp.ne.s32.totalorder %s325_s1, %s444_s2  ;;  %p449_p1 = scmp.lt.s32.totalorder %s325_s1, %s325_s1 }
 0x108   :  { %p450_p2 = scmp.lt.s32.totalorder %s448_s20, %s444_s2 }
 0x10a   :  { %p451_p3 = por %p450_p2, %p449_p1 }
 0x10c   :  { %p452_p4 = pnand %p451_p3, %p445_p0 }
 0x10e   :  { %455 = shalt.err (!%p452_p4)
}
 0x10f   :  { %s456_s23 = scalar_lea.hbm %s601_s3, 64 }
 0x110   :  { %p457_p5 = scmp.ne.s32.totalorder %s601_s3, %s456_s23  ;;  %p460_p6 = scmp.lt.u32.totalorder %s456_s23, %s601_s3 }
 0x112   :  { %p462_p7 = pnand %p460_p6, %p457_p5 }
 0x114   :  { %465 = shalt.err (!%p462_p7)
}
 0x115   :  { %s471_s28 = smov 64   ;;  %s472_s29 = smov 4  }
 0x116   :  { %330 = dma.vmem_to_hbm [thread:$0]  %s325_s1, 64, %s601_s3, [#allocation3], %s471_s28, %s471_s28, %s472_s29  }
 0x117   :  { %466 = dma.done.wait [#allocation3], 128  }
 0x118   :  { %467 = vsyncadd [#allocation3], 4294967168 }
 0x119   :  { %334 = vsyncpa [#allocation3], 1 }

</bundles_post_ra>
